<compile_context>
chip_gen: v7x
topology: tpu7x:2x2x1
jax: 0.10.0
libtpu: 0.0.40
codegen_flags: <defaults>
</compile_context>

<pallas_src>
import functools
import math

import jax
import jax.numpy as jnp
from jax.experimental import pallas as pl
from jax.experimental.pallas import tpu as pltpu


def _round_up(x, m):
    return ((x + m - 1) // m) * m


def _cdiv(a, b):
    return (a + b - 1) // b


# ---------------------------------------------------------------------------
# Kernel 1: scale table by sqrt(d_model).  Output is just (K, d); the
# (1, num_heads, K, d) view is a metadata broadcast in the wrapper (no H
# redundant HBM copies written by the kernel).
# ---------------------------------------------------------------------------
def _scale_table_kernel(w_ref, out_ref, *, scale):
    out_ref[...] = w_ref[...] * scale


def get_rel_weights(weight, num_heads):
    K, d = weight.shape
    scale = math.sqrt(d)
    # Tile over K (sublane-aligned divisor) so HBM read / VPU mul / HBM write
    # pipeline across grid steps; "parallel" lets v7x's 2 TCs split the work.
    tk = math.gcd(K, 256) if K % 8 == 0 else K
    scaled = pl.pallas_call(
        functools.partial(_scale_table_kernel, scale=scale),
        out_shape=jax.ShapeDtypeStruct((K, d), weight.dtype),
        grid_spec=pltpu.PrefetchScalarGridSpec(
            num_scalar_prefetch=0,
            grid=(K // tk,),
            in_specs=[pl.BlockSpec((tk, d), lambda i: (i, 0))],
            out_specs=pl.BlockSpec((tk, d), lambda i: (i, 0)),
        ),
        compiler_params=pltpu.CompilerParams(
            dimension_semantics=("parallel",)),
    )(weight)
    # Head repeat as a broadcast view outside the kernel.
    return jnp.broadcast_to(scaled[None, None], (1, num_heads, K, d))


# ---------------------------------------------------------------------------
# Kernel 2: embedding lookup (one-hot @ table on the MXU) + sqrt(d) scale.
# Output block is (tn, d) only -- the num_heads repeat along the last dim is
# done outside the kernel, cutting kernel HBM writes by num_heads.
# ---------------------------------------------------------------------------
def _p2v_kernel(idx_ref, w_ref, out_ref, *, scale):
    K, d = w_ref.shape
    idx = idx_ref[...]                                       # (tn, 1) int32
    tn = idx.shape[0]
    iota = jax.lax.broadcasted_iota(jnp.int32, (tn, K), 1)
    onehot = (idx == iota).astype(w_ref.dtype)               # (tn, K)
    # Scale the small (tn, d) result, not the resident (K, d) table.
    emb = jnp.dot(onehot, w_ref[...],
                  preferred_element_type=jnp.float32) * scale
    out_ref[...] = emb.astype(out_ref.dtype)


def get_p2v_emb(inputs, weight, num_heads, *, tile_rows=1024):
    B, Lq, Lk = inputs.shape
    K, d = weight.shape
    N = B * Lq * Lk
    scale = math.sqrt(d)
    itemsize = 4

    # --- VMEM-budgeted, balanced row tile -------------------------------
    # per-row VMEM: double-buffered (tn, d) output + (tn, K) one-hot +
    # (tn, d) matmul result + tiny idx buffers.  Table is single-buffered
    # (pl.Buffered(1)) since its index_map is constant.
    table_bytes = K * d * itemsize
    per_row = (2 * d + K + d + 4) * itemsize
    budget = 24 << 20                       # conservative across v5e/v6e/v7x
    max_rows = max(8, (budget - table_bytes) // per_row)
    tile_rows = max(8, (min(tile_rows, max_rows) // 8) * 8)

    n_tiles = _cdiv(N, tile_rows)
    tn = max(8, _round_up(_cdiv(N, n_tiles), 8))   # balanced: pad < 8 rows/tile
    N_pad = n_tiles * tn

    idx2d = inputs.reshape(N, 1).astype(jnp.int32)
    if N_pad != N:
        # Pad with K (outside one-hot range -> zero rows); sliced off below.
        idx2d = jnp.pad(idx2d, ((0, N_pad - N), (0, 0)), constant_values=K)

    vmem_est = table_bytes + tn * per_row
    vmem_limit = int(min(max(2 * vmem_est, 32 << 20), 48 << 20))

    # NOTE: lane-dense output wants d a multiple of 128 for unmasked vst; if a
    # config uses an odd d_model, pad the table's lane dim once outside instead.
    kernel = functools.partial(_p2v_kernel, scale=scale)
    out_flat = pl.pallas_call(
        kernel,
        out_shape=jax.ShapeDtypeStruct((N_pad, d), weight.dtype),
        grid_spec=pltpu.PrefetchScalarGridSpec(
            num_scalar_prefetch=0,
            grid=(N_pad // tn,),
            in_specs=[
                pl.BlockSpec((tn, 1), lambda i: (i, 0)),        # index rows
                pl.BlockSpec((K, d), lambda i: (0, 0),          # resident table
                             pipeline_mode=pl.Buffered(1)),
            ],
            out_specs=pl.BlockSpec((tn, d), lambda i: (i, 0)),
        ),
        compiler_params=pltpu.CompilerParams(
            dimension_semantics=("parallel",),
            vmem_limit_bytes=vmem_limit),
    )(idx2d, weight)

    emb = out_flat[:N].reshape(B, Lq, Lk, d)
    # Head repeat done lazily outside the kernel (== torch .repeat(1,1,1,H)).
    rel_v = jnp.broadcast_to(emb[..., None, :], (B, Lq, Lk, num_heads, d))
    return rel_v.reshape(B, Lq, Lk, num_heads * d)


# ---------------------------------------------------------------------------
# Module-equivalent wrapper
# ---------------------------------------------------------------------------
class DebertaRelEmbeddingsPallas:
    def __init__(self, d_model, num_heads, k, pos_type, dropout=0.0, seed=0):
        self.d_model = d_model
        self.K = 2 * k + 2
        self.num_heads = num_heads
        self.pos_type = pos_type
        # TODO(synk): dropout > 0 would need pltpu.prng_* masking; dropout==0 is identity.
        key = jax.random.PRNGKey(seed)

        def make_table(k_):
            w = jax.random.normal(k_, (self.K, d_model), dtype=jnp.float32)
            return w.at[self.K // 2].set(0.0)   # nn.Embedding padding_idx row

        kq, kk, kv = jax.random.split(key, 3)
        self.w_q = make_table(kq) if 'p2q' in pos_type else None
        self.w_k = make_table(kk) if 'p2k' in pos_type else None
        self.w_v = make_table(kv) if 'p2v' in pos_type else None

    def __call__(self, inputs):
        rel_q = rel_k = rel_v = None
        if self.w_q is not None:
            rel_q = get_rel_weights(self.w_q, self.num_heads)
        if self.w_k is not None:
            rel_k = get_rel_weights(self.w_k, self.num_heads)
        if self.w_v is not None:
            rel_v = get_p2v_emb(inputs, self.w_v, self.num_heads)
        return rel_q, rel_k, rel_v


if __name__ == "__main__":
    d_model, num_heads, k = 32, 4, 3          # K = 2*3+2 = 8
    B, Lq, Lk = 2, 8, 8
    mod = DebertaRelEmbeddingsPallas(d_model, num_heads, k,
                                     pos_type='p2q_p2k_p2v', dropout=0.0)

    key = jax.random.PRNGKey(0)
    inputs = jax.random.randint(key, (B, Lq, Lk), 0, mod.K, dtype=jnp.int32)

    rel_q, rel_k, rel_v = mod(inputs)
    jax.block_until_ready((rel_q, rel_k, rel_v))

    # lightweight correctness check vs pure-JAX reference
    scale = math.sqrt(d_model)
    ref_q = jnp.broadcast_to((mod.w_q * scale)[None, None],
                             (1, num_heads, mod.K, d_model))
    ref_k = jnp.broadcast_to((mod.w_k * scale)[None, None],
                             (1, num_heads, mod.K, d_model))
    emb_v = mod.w_v[inputs] * scale
    ref_v = jnp.concatenate([emb_v] * num_heads, axis=-1)
    assert rel_q.shape == (1, num_heads, mod.K, d_model)
    assert rel_k.shape == (1, num_heads, mod.K, d_model)
    assert rel_v.shape == (B, Lq, Lk, d_model * num_heads)
    assert jnp.allclose(rel_q, ref_q, atol=1e-5)
    assert jnp.allclose(rel_k, ref_k, atol=1e-5)
    assert jnp.allclose(rel_v, ref_v, atol=1e-5)

    print("KERNEL_OK")
</pallas_src>

<mosaic_0001>
module attributes {stable_mosaic.version = 11 : i64} {
  func.func @_scale_table_kernel(%arg0: i32, %arg1: memref<8x32xf32, #tpu.memory_space<vmem>>, %arg2: memref<8x32xf32, #tpu.memory_space<vmem>>) attributes {dimension_semantics = [#tpu.dimension_semantics<parallel>], iteration_bounds = array<i64: 1>, scalar_prefetch = 0 : i64, scratch_operands = 0 : i64, tpu.core_type = #tpu.core_type<tc>, window_params = [{transform_indices = @transform_0, window_bounds = array<i64: 8, 32>}, {transform_indices = @transform_1, window_bounds = array<i64: 8, 32>}]} {
    %c0 = arith.constant 0 : index
    %c0_0 = arith.constant 0 : index
    %0 = vector.load %arg1[%c0, %c0_0] : memref<8x32xf32, #tpu.memory_space<vmem>>, vector<8x32xf32>
    %cst = arith.constant 5.65685415 : f32
    %1 = vector.broadcast %cst : f32 to vector<8x32xf32>
    %2 = arith.mulf %0, %1 : vector<8x32xf32>
    %c0_1 = arith.constant 0 : index
    %c0_2 = arith.constant 0 : index
    %3 = vector.load %arg2[%c0_1, %c0_2] : memref<8x32xf32, #tpu.memory_space<vmem>>, vector<8x32xf32>
    tpu.vector_store %arg2[%c0_1, %c0_2], %2 {strides = array<i32>} : memref<8x32xf32, #tpu.memory_space<vmem>>, vector<8x32xf32>,
    return
  }
  func.func @transform_0(%arg0: i32) -> (i32, i32) {
    %c0_i32 = arith.constant 0 : i32
    %c0_i32_0 = arith.constant 0 : i32
    return %arg0, %c0_i32 : i32, i32
  }
  func.func @transform_1(%arg0: i32) -> (i32, i32) {
    %c0_i32 = arith.constant 0 : i32
    %c0_i32_0 = arith.constant 0 : i32
    return %arg0, %c0_i32 : i32, i32
  }
}

</mosaic_0001>

<bundles_post_ra>
// kernel: tpu_custom_call.1
= control target key start
LH: loop header
LB: loop body
LE: loop exit
PB: predicated region body
PF: predicated region fallthrough
CT: control target
= control target key end

     0   :  { %6 = vsyncpa [#allocation3], 0  ;;  %s126_s0 = inlined_call_operand.hbm [shape: f32[8,32], index: 0, kind: input, shape index: {}]   ;;  %s127_s1 = inlined_call_operand.hbm [shape: f32[8,32], index: 1, kind: output, shape index: {}]  }
   0x1   :  { %7 = vsyncpa [#allocation4], 0  ;;  %s90_s6 = smov [#allocation2]   ;;  %s42_s10 = scalar_lea.hbm %s126_s0, 128 }
   0x2   :  { %s14_s7 = sshll.u32 %s90_s6, 4  ;;  %p43_p0 = scmp.ne.s32.totalorder %s126_s0, %s42_s10  ;;  %s15_s7 = int_to_ptr.vmem [resolvable:$true] %s14_s7 }
   0x3   :  { %p46_p1 = scmp.lt.u32.totalorder %s42_s10, %s126_s0 }
   0x5   :  { %p48_p2 = pnand %p46_p1, %p43_p0 }
   0x7   :  { %51 = shalt.err (!%p48_p2)
}
   0x8   :  { %s52_s15 = scalar_lea.vmem %s15_s7, 128  ;;  %p57_p4 = scmp.lt.s32.totalorder %s15_s7, %s15_s7 }
   0x9   :  { %p53_p3 = scmp.ne.s32.totalorder %s15_s7, %s52_s15  ;;  %p58_p5 = scmp.lt.s32.totalorder %s52_s15, %s52_s15 }
   0xb   :  { %p59_p6 = por %p58_p5, %p57_p4 }
   0xd   :  { %p60_p7 = pnand %p59_p6, %p53_p3 }
   0xf   :  { %63 = shalt.err (!%p60_p7)
}
  0x10   :  { %17 = dma.hbm_to_vmem [thread:$0]  %s126_s0, 128, %s15_s7, [#allocation3]  }
  0x11   :  { %86 = dma.done.wait [#allocation3], 128  }
  0x12   :  { %87 = vsyncadd [#allocation3], 4294967168  ;;  %s91_s18 = smov [#allocation5]   ;;  %v21_v0 = vld [vmem:[#allocation2] sm:$0xff]  ;;  %vm23_vm0 = vcmask 261120  }
  0x13   :  { %s31_s19 = sshll.u32 %s91_s18, 4  ;;  %v22_v1 = vmul.f32 5.656854, %v21_v0  ;;  %s32_s19 = int_to_ptr.vmem [resolvable:$true] %s31_s19 }
  0x14   :  { %s64_s20 = scalar_lea.vmem %s32_s19, 128  ;;  %p69_p9 = scmp.lt.s32.totalorder %s32_s19, %s32_s19 }
  0x15   :  { %24 = vst.msk [vmem:[#allocation5] sm:$0xff] %vm23_vm0, %v22_v1  ;;  %p65_p8 = scmp.ne.s32.totalorder %s32_s19, %s64_s20  ;;  %p70_p10 = scmp.lt.s32.totalorder %s64_s20, %s64_s20 }
  0x17   :  { %p71_p11 = por %p70_p10, %p69_p9 }
  0x19   :  { %p72_p12 = pnand %p71_p11, %p65_p8 }
  0x1b   :  { %75 = shalt.err (!%p72_p12)
}
  0x1c   :  { %s76_s0 = scalar_lea.hbm %s127_s1, 128 }
  0x1d   :  { %p77_p13 = scmp.ne.s32.totalorder %s127_s1, %s76_s0  ;;  %p80_p0 = scmp.lt.u32.totalorder %s76_s0, %s127_s1 }
  0x1f   :  { %p82_p1 = pnand %p80_p0, %p77_p13 }
  0x21   :  { %85 = shalt.err (!%p82_p1)
}
  0x22   :  { %34 = dma.vmem_to_hbm [thread:$0]  %s32_s19, 128, %s127_s1, [#allocation4]  }
  0x23   :  { %88 = dma.done.wait [#allocation4], 128  }
  0x24   :  { %89 = vsyncadd [#allocation4], 4294967168 }
  0x25   :  { %38 = vsyncpa [#allocation3], 1 }
  0x26   :  { %39 = vsyncpa [#allocation4], 1 }

</bundles_post_ra>
